<compile_context>
chip_gen: v5e
topology: v5e:2x2
jax: 0.10.0
libtpu: 0.0.40
codegen_flags: <defaults>
</compile_context>

<pallas_src>
import jax
import jax.numpy as jnp
from jax.experimental import pallas as pl
from jax.experimental.pallas import tpu as pltpu

# ---------------- small config (scaled-down from the PyTorch defaults) -------
VOCAB_SIZE = 128          # vocab_size (PyTorch default 8000)
PAD_IDX = 1               # padding_idx
MAX_SEQ_LEN = 16          # max_seq_len (PyTorch default 256)
D_MODEL = 128             # d_model (PyTorch default 512); 128 -> lane-dense


# ---------------- positional embedding table (module init-time constant) -----
def get_pos_emb(max_seq_len, d_model):
    """Matches TransformerEmbedding.get_pos_emb exactly (sin on even j, cos on odd j)."""
    pos = jnp.arange(max_seq_len, dtype=jnp.float32)[:, None]          # (L, 1)
    j = jnp.arange(d_model)[None, :]                                   # (1, D)
    even = (j % 2) == 0
    exponent = jnp.where(even, j, j - 1).astype(jnp.float32) / d_model
    angle = pos / jnp.power(10000.0, exponent)
    return jnp.where(even, jnp.sin(angle), jnp.cos(angle)).astype(jnp.float32)


# ---------------- fused embedding kernel --------------------------------------
def _embedding_kernel(ids_ref, table_ref, pos_ref, out_ref):
    """One batch element per grid step.

    ids_ref:   (1, S, 1) int32   token ids for this batch row
    table_ref: (V, D)    float32 full word-embedding table (VMEM resident)
    pos_ref:   (S, D)    float32 positional embeddings for positions [0, S)
    out_ref:   (1, S, D) float32 word_emb[ids] + pos_emb
    """
    S = ids_ref.shape[1]
    V = table_ref.shape[0]

    ids = ids_ref[0]                                                   # (S, 1) int32
    vocab_iota = jax.lax.broadcasted_iota(jnp.int32, (S, V), 1)        # (S, V)
    onehot = (ids == vocab_iota).astype(jnp.float32)                   # (S, V)

    # Gather as a one-hot matmul on the MXU (exactly one 1.0 per row -> exact
    # row selection), then fuse the positional-embedding add before the single
    # lane-dense (S, D) store.
    word = jnp.dot(onehot, table_ref[...],
                   preferred_element_type=jnp.float32)                 # (S, D)
    out_ref[0] = word + pos_ref[...]


def transformer_embedding(ids, emb_table, pos_emb):
    """Forward of TransformerEmbedding.

    ids:       (B, S) int32 token ids
    emb_table: (V, D) float32 (row PAD_IDX is zero, as nn.Embedding(padding_idx=...))
    pos_emb:   (MAX_SEQ_LEN, D) float32
    returns    (B, S, D) float32
    """
    B, S = ids.shape
    V, D = emb_table.shape
    pos = pos_emb[:S, :]                      # pos_emb[:seq_len, :]  (glue slice)
    ids3 = ids.astype(jnp.int32)[..., None]   # (B, S, 1) so all refs stay 2/3-D

    return pl.pallas_call(
        _embedding_kernel,
        grid=(B,),
        in_specs=[
            pl.BlockSpec((1, S, 1), lambda b: (b, 0, 0)),   # this batch's ids
            pl.BlockSpec((V, D), lambda b: (0, 0)),         # full table, VMEM resident
            pl.BlockSpec((S, D), lambda b: (0, 0)),         # positional rows
        ],
        out_specs=pl.BlockSpec((1, S, D), lambda b: (b, 0, 0)),
        out_shape=jax.ShapeDtypeStruct((B, S, D), jnp.float32),
        compiler_params=pltpu.CompilerParams(
            dimension_semantics=("parallel",)               # batch shards across TCs (v7x)
        ),
    )(ids3, emb_table, pos)


# ---------------- main --------------------------------------------------------
if __name__ == "__main__":
    key = jax.random.PRNGKey(0)
    k_emb, k_ids = jax.random.split(key)

    # nn.Embedding(vocab_size, d_model, padding_idx=PAD_IDX): padding row is zero.
    emb_table = 0.02 * jax.random.normal(k_emb, (VOCAB_SIZE, D_MODEL), jnp.float32)
    emb_table = emb_table.at[PAD_IDX].set(0.0)
    pos_emb = get_pos_emb(MAX_SEQ_LEN, D_MODEL)

    B, S = 2, 8
    ids = jax.random.randint(k_ids, (B, S), 0, VOCAB_SIZE, dtype=jnp.int32)
    ids = ids.at[:, -2:].set(PAD_IDX)         # exercise the padding rows

    out = transformer_embedding(ids, emb_table, pos_emb)
    out = jax.block_until_ready(out)

    # pure-JAX reference: word_emb(x) + pos_emb[:seq_len, :]
    ref = jnp.take(emb_table, ids, axis=0) + pos_emb[:S, :][None, :, :]

    assert out.shape == (B, S, D_MODEL), out.shape
    assert bool(jnp.all(jnp.isfinite(out)))
    assert bool(jnp.allclose(out, ref, atol=1e-5, rtol=1e-5))
    print("KERNEL_OK")
</pallas_src>

<mosaic_0001>
module attributes {stable_mosaic.version = 11 : i64} {
  func.func @_embedding_kernel(%arg0: i32, %arg1: memref<1x8x1xi32, #tpu.memory_space<vmem>>, %arg2: memref<128x128xf32, #tpu.memory_space<vmem>>, %arg3: memref<8x128xf32, #tpu.memory_space<vmem>>, %arg4: memref<1x8x128xf32, #tpu.memory_space<vmem>>) attributes {dimension_semantics = [#tpu.dimension_semantics<parallel>], iteration_bounds = array<i64: 2>, scalar_prefetch = 0 : i64, scratch_operands = 0 : i64, tpu.core_type = #tpu.core_type<tc>, window_params = [{transform_indices = @transform_0, window_bounds = array<i64: 1, 8, 1>}, {pipeline_mode = #tpu.pipeline_mode<synchronous>, transform_indices = @transform_1, window_bounds = array<i64: 128, 128>}, {pipeline_mode = #tpu.pipeline_mode<synchronous>, transform_indices = @transform_2, window_bounds = array<i64: 8, 128>}, {transform_indices = @transform_3, window_bounds = array<i64: 1, 8, 128>}]} {
    %c0 = arith.constant 0 : index
    %c0_0 = arith.constant 0 : index
    %c0_1 = arith.constant 0 : index
    %0 = vector.load %arg1[%c0, %c0_0, %c0_1] : memref<1x8x1xi32, #tpu.memory_space<vmem>>, vector<1x8x1xi32>
    %1 = vector.shape_cast %0 : vector<1x8x1xi32> to vector<8x1xi32>
    %2 = tpu.iota {dimensions = array<i32: 1>} : vector<8x128xi32>
    %3 = vector.broadcast %1 : vector<8x1xi32> to vector<8x128xi32>
    %4 = arith.cmpi eq, %3, %2 : vector<8x128xi32>
    %5 = arith.extui %4 : vector<8x128xi1> to vector<8x128xi32>
    %6 = arith.sitofp %5 : vector<8x128xi32> to vector<8x128xf32>
    %c0_2 = arith.constant 0 : index
    %c0_3 = arith.constant 0 : index
    %7 = vector.load %arg2[%c0_2, %c0_3] : memref<128x128xf32, #tpu.memory_space<vmem>>, vector<128x128xf32>
    %cst = arith.constant dense<0.000000e+00> : vector<8x128xf32>
    %8 = tpu.matmul %6, %7, %cst {dimension_numbers = #tpu.dot_dimension_numbers<[1], [0], [0], [1], [0, 0, 1, 1], [], []>} : vector<8x128xf32>, vector<128x128xf32>, vector<8x128xf32> -> vector<8x128xf32>
    %c0_4 = arith.constant 0 : index
    %c0_5 = arith.constant 0 : index
    %9 = vector.load %arg3[%c0_4, %c0_5] : memref<8x128xf32, #tpu.memory_space<vmem>>, vector<8x128xf32>
    %10 = arith.addf %8, %9 : vector<8x128xf32>
    %c0_6 = arith.constant 0 : index
    %c0_7 = arith.constant 0 : index
    %c0_8 = arith.constant 0 : index
    %11 = vector.load %arg4[%c0_6, %c0_7, %c0_8] : memref<1x8x128xf32, #tpu.memory_space<vmem>>, vector<1x8x128xf32>
    %12 = vector.shape_cast %11 : vector<1x8x128xf32> to vector<8x128xf32>
    %13 = vector.shape_cast %10 : vector<8x128xf32> to vector<1x8x128xf32>
    tpu.vector_store %arg4[%c0_6, %c0_7, %c0_8], %13 {strides = array<i32>} : memref<1x8x128xf32, #tpu.memory_space<vmem>>, vector<1x8x128xf32>,
    return
  }
  func.func @transform_0(%arg0: i32) -> (i32, i32, i32) {
    %c0_i32 = arith.constant 0 : i32
    %c0_i32_0 = arith.constant 0 : i32
    %c0_i32_1 = arith.constant 0 : i32
    return %arg0, %c0_i32, %c0_i32_0 : i32, i32, i32
  }
  func.func @transform_1(%arg0: i32) -> (i32, i32) {
    %c0_i32 = arith.constant 0 : i32
    %c0_i32_0 = arith.constant 0 : i32
    %c0_i32_1 = arith.constant 0 : i32
    return %c0_i32, %c0_i32_0 : i32, i32
  }
  func.func @transform_2(%arg0: i32) -> (i32, i32) {
    %c0_i32 = arith.constant 0 : i32
    %c0_i32_0 = arith.constant 0 : i32
    %c0_i32_1 = arith.constant 0 : i32
    return %c0_i32, %c0_i32_0 : i32, i32
  }
  func.func @transform_3(%arg0: i32) -> (i32, i32, i32) {
    %c0_i32 = arith.constant 0 : i32
    %c0_i32_0 = arith.constant 0 : i32
    %c0_i32_1 = arith.constant 0 : i32
    return %arg0, %c0_i32, %c0_i32_0 : i32, i32, i32
  }
}

</mosaic_0001>

<bundles_post_ra>
// kernel: tpu_custom_call.1
= control target key start
LH: loop header
LB: loop body
LE: loop exit
PB: predicated region body
PF: predicated region fallthrough
CT: control target
= control target key end

     0   :  { %8 = vsyncpa [#allocation3], 0  ;;  %s607_s0 = inlined_call_operand.vmem [shape: s32[2,8,1], index: 0, kind: input, shape index: {}]   ;;  %s608_s1 = inlined_call_operand.hbm [shape: f32[128,128], index: 1, kind: input, shape index: {}]   ;;  %s609_s2 = inlined_call_operand.vmem [shape: f32[8,128], index: 2, kind: input, shape index: {}]   ;;  %s610_s3 = inlined_call_operand.hbm [shape: f32[2,8,128], index: 3, kind: output, shape index: {}]  }
   0x1   :  { %9 = vsyncpa [#allocation4], 0 }
   0x2   :  { %11 = vsyncpa [#allocation4 + $0x1], 0  ;;  %s509_s12 = smov 0   ;;  %s511_s13 = smov 0  }
   0x3   :  { %s513_s14 = smov 0   ;;  %s515_s15 = smov 0  }
   0x4 LB: > { %s530_s16 = sadd.s32 4294967295, %s482_s15   ;;  %s317_s17 = sadd.s32 4294967294, %s482_s15   ;;  %s482_s15 = sphi %s515_s15, %s616_s15   ;;  %s478_s14 = sphi %s513_s14, %s615_s14   ;;  %s474_s13 = sphi %s511_s13, %s614_s13   ;;  %s470_s12 = sphi %s509_s12, %s613_s12  }
   0x5   : > { %s534_s18 = sadd.s32 1, %s482_s15   ;;  %s92_s19 = sadd.s32 1, %s478_s14 }
   0x6   : > { %s89_s20 = ssub.s32 %s482_s15, %s534_s18  ;;  %p102_p0 = scmp.ne.s32.totalorder %s478_s14, %s474_s13 }
   0x7   : > { %p90_p1 = scmp.eq.s32.totalorder %s89_s20, 0  ;;  %p103_p2 = scmp.eq.s32.totalorder %s530_s16, 1 }
   0x8   : > { %p108_p3 = scmp.ne.s32.totalorder %s474_s13, %s470_s12  ;;  %p109_p4 = scmp.eq.s32.totalorder %s317_s17, 1 }
   0x9   : > { %s545_s21 = scalar_select %p90_p1, %s478_s14, %s92_s19  }
   0xa   : > { %p547_p5 = por %p103_p2, %p102_p0  ;;  %p551_p6 = por %p109_p4, %p108_p3 }
   0xb   : > { %p318_p7 = scmp.ge.s32.totalorder %s482_s15, 1  ;;  %p116_p8 = scmp.lt.s32.totalorder %s482_s15, 3 }
   0xc   : > { %p345_p9 = scmp.eq.s32.totalorder %s530_s16, 0  ;;  %s127_s26 = sshll.u32 %s608_s1, 4  ;;  %s128_s26 = int_to_ptr.hbm [resolvable:$true] %s127_s26 }
   0xd   : > { %p117_p10 = pnand %p318_p7, %p116_p8  ;;  %s484_s27 = smov [#allocation2]  }
   0xe   : > { %s129_s28 = sshll.u32 %s484_s27, 4  ;;  %s485_s29 = smov 128   ;;  %s130_s28 = int_to_ptr.vmem [resolvable:$true] %s129_s28 }
   0xf   : > { %p337_p11 = pneg %p117_p10  ;;  %s486_s30 = smov 8  }
  0x10   : > { %155 = sbr.rel (%p117_p10) target bundleno = 276 (0x114), region = 32 }
  0x11   : > { %p338_p12 = pnand %p345_p9, %p337_p11 }
  0x13   : > { %340 = dma.hbm_to_vmem [thread:$0]  (!%p338_p12), %s128_s26, 2048, %s130_s28, [#allocation3], %s485_s29, %s485_s29, %s486_s30  }
  0x15   : > { %461 = dma.done.wait (%p345_p9), [#allocation3], 2048  }
  0x16   : > { %463 = vsyncadd (%p345_p9), [#allocation3], 4294965248  ;;  %p179_p13 = scmp.lt.s32.totalorder %s530_s16, 1  ;;  %v487_v0 = vmov 0   ;;  %v207_v2 = vld [vmem:[#allocation2 + $0x78] sm:$0xff]  ;;  %v206_v3 = vld [vmem:[#allocation2 + $0x70] sm:$0xff]  ;;  %v184_v18 = vlaneseq }
  0x17   : > { %385 = vset.pattern.permute.xlu0 %v487_v0  ;;  %209 = vmatpush.msra.mxu0 %v207_v2  ;;  %v205_v4 = vld [vmem:[#allocation2 + $0x68] sm:$0xff]  ;;  %v204_v5 = vld [vmem:[#allocation2 + $0x60] sm:$0xff]  ;;  %v203_v6 = vld [vmem:[#allocation2 + $0x58] sm:$0xff]  ;;  %v488_v21 = vmov 1.0   ;;  %s176_s9 = sand.u32 1, %s474_s13   ;;  %s328_s11 = sshll.u32 %s530_s16, 3 }
  0x18   : > { %s180_s4 = scalar_select %p179_p13, %s530_s16, 1  ;;  %v202_v7 = vld [vmem:[#allocation2 + $0x50] sm:$0xff]  ;;  %v201_v8 = vld [vmem:[#allocation2 + $0x48] sm:$0xff]  ;;  %v200_v9 = vld [vmem:[#allocation2 + $0x40] sm:$0xff]  ;;  %v185_v19 = vand.u32 127, %v184_v18 }
  0x19   : > { %210 = vmatpush.msra.mxu0 %v206_v3  ;;  %v199_v10 = vld [vmem:[#allocation2 + $0x38] sm:$0xff]  ;;  %v198_v11 = vld [vmem:[#allocation2 + $0x30] sm:$0xff]  ;;  %v197_v12 = vld [vmem:[#allocation2 + $0x28] sm:$0xff]  ;;  %s323_s10 = sshll.u32 %s176_s9, 3  ;;  %s241_s20 = scalar_lea.hbm %s610_s3, %s328_s11 }
  0x1a   : > { %s324_s5 = sshll.u32 %s180_s4, 3  ;;  %v196_v13 = vld [vmem:[#allocation2 + $0x20] sm:$0xff]  ;;  %v195_v14 = vld [vmem:[#allocation2 + $0x18] sm:$0xff]  ;;  %v194_v15 = vld [vmem:[#allocation2 + $0x10] sm:$0xff]  ;;  %s178_s26 = scalar_lea.vmem [#allocation5], %s323_s10 }
  0x1b   : > { %s182_s8 = scalar_lea.vmem %s607_s0, %s324_s5  ;;  %211 = vmatpush.msra.mxu0 %v205_v4  ;;  %v193_v16 = vld [vmem:[#allocation2 + $0x8] sm:$0xff]  ;;  %v192_v17 = vld [vmem:[#allocation2] sm:$0xff]  ;;  %s243_s27 = sshll.u32 %s178_s26, 4  ;;  %s244_s27 = int_to_ptr.vmem [resolvable:$true] %s243_s27 }
  0x1c   : > { %v183_v1 = vld [vmem:[%s182_s8] sm:$0xff]  ;;  %s245_s28 = sshll.u32 %s241_s20, 4  ;;  %s231_s29 = scalar_lea.sflag [#allocation4], %s176_s9  ;;  %s246_s28 = int_to_ptr.hbm [resolvable:$true] %s245_s28 }
  0x1d   : > { %187 = vperm.xlu0 %385, %v183_v1   ;;  %212 = vmatpush.msra.mxu0 %v204_v5  ;;  %v208_v22 = vld [vmem:[%s609_s2] sm:$0xff]  ;;  %s430_s30 = sshra.s32 %s246_s28, 4  ;;  %s436_s6 = scalar_lea.hbm %s610_s3, 16  ;;  %s431_s30 = int_to_ptr.hbm [resolvable:$true] %s430_s30 }
  0x1e   : > { %s432_s16 = scalar_lea.hbm %s431_s30, 8  ;;  %p437_p3 = scmp.lt.s32.totalorder %s431_s30, %s610_s3 }
  0x1f   : > { %213 = vmatpush.msra.mxu0 %v203_v6  ;;  %p433_p0 = scmp.ne.s32.totalorder %s431_s30, %s432_s16  ;;  %p438_p4 = scmp.lt.s32.totalorder %s436_s6, %s432_s16 }
  0x21   : > { %214 = vmatpush.msra.mxu0 %v202_v7  ;;  %p434_p1 = pnand %p433_p0, %p547_p5  ;;  %p439_p7 = por %p438_p4, %p437_p3 }
  0x23   : > { %215 = vmatpush.msra.mxu0 %v201_v8  ;;  %p435_p2 = pneg %p434_p1 }
  0x25   : > { %216 = vmatpush.msra.mxu0 %v200_v9  ;;  %p440_p8 = pnand %p439_p7, %p435_p2 }
  0x27   : > { %217 = vmatpush.msra.mxu0 %v199_v10 }
  0x29   : > { %218 = vmatpush.msra.mxu0 %v198_v11 }
  0x2b   : > { %219 = vmatpush.msra.mxu0 %v197_v12 }
  0x2d   : > { %220 = vmatpush.msra.mxu0 %v196_v13 }
  0x2f   : > { %221 = vmatpush.msra.mxu0 %v195_v14 }
  0x31   : > { %222 = vmatpush.msra.mxu0 %v194_v15 }
  0x33   : > { %223 = vmatpush.msra.mxu0 %v193_v16 }
  0x35   : > { %224 = vmatpush.msra.mxu0 %v192_v17 }
  0x8f   : > { %v188_v20 = vpop.permute.xlu0 %187 }
  0x90   : > { %vm189_vm0 = vcmp.eq.s32.totalorder %v188_v20, %v185_v19 }
  0x91   : > { %326 = vmatmul.msk.f32.vlgmr.msra.gmra.mxu0 %vm189_vm0, %v488_v21 }
 0x10e   : > { %v226_v23 = vpop.f32.mrf.mxu0 }
 0x10f   : > { %v227_v24 = vadd.f32 %v226_v23, %v208_v22 }
 0x111   : > { %229 = vst [vmem:[%s178_s26] sm:$0xff] %v227_v24 }
 0x112   : > { %443 = shalt.err (!%p440_p8)
}
 0x113   : > { %335 = dma.vmem_to_hbm [thread:$0]  (%p547_p5), %s244_s27, 128, %s246_s28, %s231_s29  }
 0x114 PF: > { %p347_p9 = scmp.ge.s32.totalorder %s482_s15, 2  ;;  %s257_s9 = sand.u32 1, %s470_s12  }
 0x115   : > { %s258_s10 = scalar_lea.sflag [#allocation4], %s257_s9 }
 0x116   : > { %p342_p10 = pnand %p347_p9, %p551_p6 }
 0x118   : > { %p343_p11 = pneg %p342_p10 }
 0x11a   : > { %465 = dma.done.wait (%p343_p11), %s258_s10, 128  }
 0x11b   : > { %467 = vsyncadd (%p343_p11), %s258_s10, 4294967168  ;;  %p14_p12 = scmp.ge.s32.totalorder %s534_s18, 4   ;;  %s613_s12 = smov %s474_s13 }
 0x11c   : > { %s614_s13 = smov %s478_s14  ;;  %s615_s14 = smov %s545_s21 }
 0x11d   : > { %s616_s15 = smov %s534_s18  ;;  %16 = sbr.rel (!%p14_p12) target bundleno = 4 (0x4), region = 72 }
 0x122   :  { %264 = vsyncpa [#allocation3], 1 }
 0x123   :  { %266 = vsyncpa [#allocation3 + $0x1], 1 }
 0x124   :  { %267 = vsyncpa [#allocation4], 1 }
 0x125   :  { %269 = vsyncpa [#allocation4 + $0x1], 1 }

</bundles_post_ra>
